<compile_context>
chip_gen: v7x
topology: tpu7x:2x2x1
jax: 0.10.0
libtpu: 0.0.40
codegen_flags: <defaults>
</compile_context>

<pallas_src>
import jax
import jax.numpy as jnp
from jax import lax
from jax.experimental import pallas as pl
from jax.experimental.pallas import tpu as pltpu


def _mha_flash_kernel(x_ref, ctx_ref, wq_ref, wk_ref, wv_ref, wo_ref, bo_ref,
                      o_ref, q_s, acc_s, o_acc, m_s, l_s):
    """One grid step = (batch b, query tile qi, head h, key tile ki)."""
    h = pl.program_id(2)
    nh = pl.num_programs(2)
    ki = pl.program_id(3)
    nk = pl.num_programs(3)

    # New (query tile, head) pair: project q for this head (scale already folded
    # into wq on the host) and reset the online-softmax state.
    @pl.when(ki == 0)
    def _():
        q = jnp.dot(x_ref[0], wq_ref[0], preferred_element_type=jnp.float32)
        q_s[...] = q.astype(jnp.bfloat16)                       # (TQ, dh) bf16
        m_s[...] = jnp.full_like(m_s, -jnp.inf)
        l_s[...] = jnp.zeros_like(l_s)
        acc_s[...] = jnp.zeros_like(acc_s)

    # Project this head's k, v for the current key tile (bf16 MXU, f32 accumulate).
    ctx = ctx_ref[0]                                            # (TK, Dc) bf16
    k = jnp.dot(ctx, wk_ref[0],
                preferred_element_type=jnp.float32).astype(jnp.bfloat16)
    v = jnp.dot(ctx, wv_ref[0],
                preferred_element_type=jnp.float32).astype(jnp.bfloat16)

    # Scores: NT contraction on the MXU, no explicit k.T materialization.
    s = lax.dot_general(q_s[...], k, (((1,), (1,)), ((), ())),
                        preferred_element_type=jnp.float32)     # (TQ, TK) f32

    # Online softmax update (f32).
    m_new = jnp.maximum(m_s[...], jnp.max(s, axis=-1, keepdims=True))
    alpha = jnp.exp(m_s[...] - m_new)
    p = jnp.exp(s - m_new)
    l_s[...] = alpha * l_s[...] + jnp.sum(p, axis=-1, keepdims=True)
    acc_s[...] = alpha * acc_s[...] + jnp.dot(p.astype(jnp.bfloat16), v,
                                              preferred_element_type=jnp.float32)
    m_s[...] = m_new

    # Last key tile: deferred softmax normalization, then fold this head's slice
    # of the output projection (to_out) into a resident f32 accumulator; the
    # output block is written once when the last head finishes.
    @pl.when(ki == nk - 1)
    def _():
        attn = acc_s[...] * pl.reciprocal(l_s[...], approx=True)   # (TQ, dh) f32
        part = jnp.dot(attn.astype(jnp.bfloat16), wo_ref[0],
                       preferred_element_type=jnp.float32)         # (TQ, Dq) f32

        @pl.when(h == 0)
        def _():
            o_acc[...] = part

        @pl.when(h > 0)
        def _():
            o_acc[...] = o_acc[...] + part

        @pl.when(h == nh - 1)
        def _():
            o_ref[0] = o_acc[...] + bo_ref[...]


def _pick_tile(n, cap):
    """Largest multiple-of-8 divisor of n that is <= cap (or n itself)."""
    if n <= cap:
        return n
    for t in range(cap, 7, -8):
        if n % t == 0:
            return t
    return n


def _pad2(r, c, esize):
    """VMEM footprint of an (r, c) tile padded to the (8, 128) layout."""
    return (-(-r // 8) * 8) * (-(-c // 128) * 128) * esize


def _vmem_limit_bytes(tq, tk, dq, dc, dh):
    blocks = (_pad2(tq, dq, 2)            # x tile (bf16)
              + _pad2(tk, dc, 2)          # context tile (bf16)
              + _pad2(dq, dh, 2)          # wq head slice
              + 2 * _pad2(dc, dh, 2)      # wk, wv head slices
              + _pad2(dh, dq, 2)          # wo head slice
              + _pad2(1, dq, 4)           # bias
              + _pad2(tq, dq, 4))         # output tile (f32)
    scratch = (_pad2(tq, dh, 2)           # q
               + _pad2(tq, dh, 4)         # online-softmax acc
               + _pad2(tq, dq, 4)         # output-projection acc
               + 2 * _pad2(tq, 1, 4))     # m, l
    need = 2 * blocks + scratch           # double-buffered pipeline + scratch
    return int(min(max(2 * need, 8 << 20), 64 << 20))


def cross_attention_video(x, params, context=None, *, tq=None, tk=None):
    """Forward of CrossAttention_Video (mask / additional_tokens not supported).

    x:       (B, N, query_dim) float32
    context: (B, M, context_dim) float32 or None (-> self attention)
    params:  heads, to_q/to_k/to_v weights (inner, D*), to_out weight (Dq, inner)
             and bias (Dq,).
    """
    # TODO(synk): attn_mask, additional_tokens and n_times_crossframe_attn_in_self
    # paths of the PyTorch forward are not implemented (default-off in the spec).
    heads = int(params["heads"])
    wq, wk, wv = params["wq"], params["wk"], params["wv"]
    wo, bo = params["wo"], params["bo"]
    inner, dq = wq.shape
    dh = inner // heads
    scale = float(dh) ** -0.5

    x = jnp.asarray(x, jnp.float32)
    context = x if context is None else jnp.asarray(context, jnp.float32)
    b, n, _ = x.shape
    _, m, dc = context.shape

    tq = _pick_tile(n, 256) if tq is None else tq
    tk = _pick_tile(m, 512) if tk is None else tk
    assert n % tq == 0 and m % tk == 0, (n, tq, m, tk)

    # Per-head weight layouts so a BlockSpec selects one head slice per grid step.
    #   q_h = x   @ wq_h[h]   (softmax scale folded in)
    #   k_h = ctx @ wk_h[h],  v_h = ctx @ wv_h[h]
    #   out += attn_h @ wo_h[h]
    wq_h = (wq.reshape(heads, dh, dq).transpose(0, 2, 1) * scale).astype(jnp.bfloat16)
    wk_h = wk.reshape(heads, dh, dc).transpose(0, 2, 1).astype(jnp.bfloat16)
    wv_h = wv.reshape(heads, dh, dc).transpose(0, 2, 1).astype(jnp.bfloat16)
    wo_h = wo.reshape(dq, heads, dh).transpose(1, 2, 0).astype(jnp.bfloat16)
    bo2 = bo.reshape(1, dq).astype(jnp.float32)

    xb = x.astype(jnp.bfloat16)
    cb = context.astype(jnp.bfloat16)

    grid = (b, n // tq, heads, m // tk)

    out = pl.pallas_call(
        _mha_flash_kernel,
        out_shape=jax.ShapeDtypeStruct((b, n, dq), jnp.float32),
        grid_spec=pltpu.PrefetchScalarGridSpec(
            num_scalar_prefetch=0,
            grid=grid,
            in_specs=[
                pl.BlockSpec((1, tq, dq), lambda bi, qi, hi, ki: (bi, qi, 0)),  # x
                pl.BlockSpec((1, tk, dc), lambda bi, qi, hi, ki: (bi, ki, 0)),  # context
                pl.BlockSpec((1, dq, dh), lambda bi, qi, hi, ki: (hi, 0, 0)),   # wq (head)
                pl.BlockSpec((1, dc, dh), lambda bi, qi, hi, ki: (hi, 0, 0)),   # wk (head)
                pl.BlockSpec((1, dc, dh), lambda bi, qi, hi, ki: (hi, 0, 0)),   # wv (head)
                pl.BlockSpec((1, dh, dq), lambda bi, qi, hi, ki: (hi, 0, 0)),   # wo (head)
                pl.BlockSpec((1, dq), lambda bi, qi, hi, ki: (0, 0)),           # bias
            ],
            out_specs=pl.BlockSpec((1, tq, dq), lambda bi, qi, hi, ki: (bi, qi, 0)),
            scratch_shapes=[
                pltpu.VMEM((tq, dh), jnp.bfloat16),   # q (current head / query tile)
                pltpu.VMEM((tq, dh), jnp.float32),    # online-softmax accumulator
                pltpu.VMEM((tq, dq), jnp.float32),    # output-projection accumulator
                pltpu.VMEM((tq, 1), jnp.float32),     # running max m
                pltpu.VMEM((tq, 1), jnp.float32),     # running sum l
            ],
        ),
        compiler_params=pltpu.CompilerParams(
            dimension_semantics=("parallel", "parallel", "arbitrary", "arbitrary"),
            vmem_limit_bytes=_vmem_limit_bytes(tq, tk, dq, dc, dh),
        ),
    )(xb, cb, wq_h, wk_h, wv_h, wo_h, bo2)
    return out


def _reference(x, context, params):
    """Pure-jnp f32 reference mirroring the PyTorch forward exactly."""
    heads = int(params["heads"])
    wq, wk, wv, wo, bo = (params["wq"], params["wk"], params["wv"],
                          params["wo"], params["bo"])
    inner = wq.shape[0]
    dh = inner // heads
    b, n, _ = x.shape
    m = context.shape[1]

    q = x @ wq.T
    k = context @ wk.T
    v = context @ wv.T
    q = q.reshape(b, n, heads, dh).transpose(0, 2, 1, 3)
    k = k.reshape(b, m, heads, dh).transpose(0, 2, 1, 3)
    v = v.reshape(b, m, heads, dh).transpose(0, 2, 1, 3)
    s = jnp.einsum("bhnd,bhmd->bhnm", q, k) * (float(dh) ** -0.5)
    p = jax.nn.softmax(s, axis=-1)
    o = jnp.einsum("bhnm,bhmd->bhnd", p, v)
    o = o.transpose(0, 2, 1, 3).reshape(b, n, inner)
    return o @ wo.T + bo.reshape(1, 1, -1)


if __name__ == "__main__":
    # Small but non-trivial config: cross attention with different context dim,
    # 2 query tiles x 2 key tiles x 2 heads so every grid axis is exercised.
    B, N, M = 2, 128, 64
    query_dim, context_dim = 64, 32
    heads, dim_head = 2, 64
    inner = heads * dim_head

    key = jax.random.PRNGKey(0)
    kx, kc, k1, k2, k3, k4, k5 = jax.random.split(key, 7)
    x = jax.random.normal(kx, (B, N, query_dim), jnp.float32)
    ctx = jax.random.normal(kc, (B, M, context_dim), jnp.float32)
    params = {
        "heads": heads,
        "wq": jax.random.normal(k1, (inner, query_dim), jnp.float32) / query_dim ** 0.5,
        "wk": jax.random.normal(k2, (inner, context_dim), jnp.float32) / context_dim ** 0.5,
        "wv": jax.random.normal(k3, (inner, context_dim), jnp.float32) / context_dim ** 0.5,
        "wo": jax.random.normal(k4, (query_dim, inner), jnp.float32) / inner ** 0.5,
        "bo": jax.random.normal(k5, (query_dim,), jnp.float32) * 0.01,
    }

    out = cross_attention_video(x, params, context=ctx, tq=64, tk=32)
    out = jax.block_until_ready(out)

    ref = jax.block_until_ready(_reference(x, ctx, params))
    assert out.shape == (B, N, query_dim)
    max_err = float(jnp.max(jnp.abs(out - ref)))
    mean_err = float(jnp.mean(jnp.abs(out - ref)))
    # bf16 MXU inputs (f32 accumulation) -> loosened tolerance vs. the f32 reference.
    assert max_err < 1e-1, (max_err, mean_err)
    assert mean_err < 2e-2, (max_err, mean_err)
    print("KERNEL_OK")
</pallas_src>

<mosaic_0001>
module attributes {stable_mosaic.version = 11 : i64} {
  func.func @_mha_flash_kernel(%arg0: i32, %arg1: i32, %arg2: i32, %arg3: i32, %arg4: memref<1x64x64xbf16, #tpu.memory_space<vmem>>, %arg5: memref<1x32x32xbf16, #tpu.memory_space<vmem>>, %arg6: memref<1x64x64xbf16, #tpu.memory_space<vmem>>, %arg7: memref<1x32x64xbf16, #tpu.memory_space<vmem>>, %arg8: memref<1x32x64xbf16, #tpu.memory_space<vmem>>, %arg9: memref<1x64x64xbf16, #tpu.memory_space<vmem>>, %arg10: memref<1x64xf32, #tpu.memory_space<vmem>>, %arg11: memref<1x64x64xf32, #tpu.memory_space<vmem>>, %arg12: memref<64x64xbf16, #tpu.memory_space<vmem>>, %arg13: memref<64x64xf32, #tpu.memory_space<vmem>>, %arg14: memref<64x64xf32, #tpu.memory_space<vmem>>, %arg15: memref<64x1xf32, #tpu.memory_space<vmem>>, %arg16: memref<64x1xf32, #tpu.memory_space<vmem>>) attributes {dimension_semantics = [#tpu.dimension_semantics<parallel>, #tpu.dimension_semantics<parallel>, #tpu.dimension_semantics<arbitrary>, #tpu.dimension_semantics<arbitrary>], iteration_bounds = array<i64: 2, 2, 2, 2>, scalar_prefetch = 0 : i64, scratch_operands = 5 : i64, tpu.core_type = #tpu.core_type<tc>, window_params = [{transform_indices = @transform_0, window_bounds = array<i64: 1, 64, 64>}, {transform_indices = @transform_1, window_bounds = array<i64: 1, 32, 32>}, {transform_indices = @transform_2, window_bounds = array<i64: 1, 64, 64>}, {transform_indices = @transform_3, window_bounds = array<i64: 1, 32, 64>}, {transform_indices = @transform_4, window_bounds = array<i64: 1, 32, 64>}, {transform_indices = @transform_5, window_bounds = array<i64: 1, 64, 64>}, {pipeline_mode = #tpu.pipeline_mode<synchronous>, transform_indices = @transform_6, window_bounds = array<i64: 1, 64>}, {transform_indices = @transform_7, window_bounds = array<i64: 1, 64, 64>}]} {
    %c0_i32 = arith.constant 0 : i32
    %0 = arith.cmpi eq, %arg3, %c0_i32 : i32
    %1 = arith.extui %0 : i1 to i32
    %c0_i32_0 = arith.constant 0 : i32
    %2 = arith.cmpi ne, %1, %c0_i32_0 : i32
    scf.if %2 {
      %c0_31 = arith.constant 0 : index
      %c0_32 = arith.constant 0 : index
      %c0_33 = arith.constant 0 : index
      %42 = vector.load %arg4[%c0_31, %c0_32, %c0_33] : memref<1x64x64xbf16, #tpu.memory_space<vmem>>, vector<1x64x64xbf16>
      %43 = vector.shape_cast %42 : vector<1x64x64xbf16> to vector<64x64xbf16>
      %c0_34 = arith.constant 0 : index
      %c0_35 = arith.constant 0 : index
      %c0_36 = arith.constant 0 : index
      %44 = vector.load %arg6[%c0_34, %c0_35, %c0_36] : memref<1x64x64xbf16, #tpu.memory_space<vmem>>, vector<1x64x64xbf16>
      %45 = vector.shape_cast %44 : vector<1x64x64xbf16> to vector<64x64xbf16>
      %cst_37 = arith.constant dense<0.000000e+00> : vector<64x64xf32>
      %46 = tpu.matmul %43, %45, %cst_37 {dimension_numbers = #tpu.dot_dimension_numbers<[1], [0], [0], [1], [0, 0, 1, 1], [], []>} : vector<64x64xbf16>, vector<64x64xbf16>, vector<64x64xf32> -> vector<64x64xf32>
      %47 = arith.truncf %46 : vector<64x64xf32> to vector<64x64xbf16>
      %c0_38 = arith.constant 0 : index
      %c0_39 = arith.constant 0 : index
      %48 = vector.load %arg12[%c0_38, %c0_39] : memref<64x64xbf16, #tpu.memory_space<vmem>>, vector<64x64xbf16>
      tpu.vector_store %arg12[%c0_38, %c0_39], %47 {strides = array<i32>} : memref<64x64xbf16, #tpu.memory_space<vmem>>, vector<64x64xbf16>,
      %cst_40 = arith.constant 0xFF800000 : f32
      %49 = vector.broadcast %cst_40 : f32 to vector<64x1xf32>
      %c0_41 = arith.constant 0 : index
      %c0_42 = arith.constant 0 : index
      %50 = vector.load %arg15[%c0_41, %c0_42] : memref<64x1xf32, #tpu.memory_space<vmem>>, vector<64x1xf32>
      tpu.vector_store %arg15[%c0_41, %c0_42], %49 {strides = array<i32>} : memref<64x1xf32, #tpu.memory_space<vmem>>, vector<64x1xf32>,
      %cst_43 = arith.constant 0.000000e+00 : f32
      %51 = vector.broadcast %cst_43 : f32 to vector<64x1xf32>
      %c0_44 = arith.constant 0 : index
      %c0_45 = arith.constant 0 : index
      %52 = vector.load %arg16[%c0_44, %c0_45] : memref<64x1xf32, #tpu.memory_space<vmem>>, vector<64x1xf32>
      tpu.vector_store %arg16[%c0_44, %c0_45], %51 {strides = array<i32>} : memref<64x1xf32, #tpu.memory_space<vmem>>, vector<64x1xf32>,
      %cst_46 = arith.constant 0.000000e+00 : f32
      %53 = vector.broadcast %cst_46 : f32 to vector<64x64xf32>
      %c0_47 = arith.constant 0 : index
      %c0_48 = arith.constant 0 : index
      %54 = vector.load %arg13[%c0_47, %c0_48] : memref<64x64xf32, #tpu.memory_space<vmem>>, vector<64x64xf32>
      tpu.vector_store %arg13[%c0_47, %c0_48], %53 {strides = array<i32>} : memref<64x64xf32, #tpu.memory_space<vmem>>, vector<64x64xf32>,
    } else {
    }
    %c0 = arith.constant 0 : index
    %c0_1 = arith.constant 0 : index
    %c0_2 = arith.constant 0 : index
    %3 = vector.load %arg5[%c0, %c0_1, %c0_2] : memref<1x32x32xbf16, #tpu.memory_space<vmem>>, vector<1x32x32xbf16>
    %4 = vector.shape_cast %3 : vector<1x32x32xbf16> to vector<32x32xbf16>
    %c0_3 = arith.constant 0 : index
    %c0_4 = arith.constant 0 : index
    %c0_5 = arith.constant 0 : index
    %5 = vector.load %arg7[%c0_3, %c0_4, %c0_5] : memref<1x32x64xbf16, #tpu.memory_space<vmem>>, vector<1x32x64xbf16>
    %6 = vector.shape_cast %5 : vector<1x32x64xbf16> to vector<32x64xbf16>
    %cst = arith.constant dense<0.000000e+00> : vector<32x64xf32>
    %7 = tpu.matmul %4, %6, %cst {dimension_numbers = #tpu.dot_dimension_numbers<[1], [0], [0], [1], [0, 0, 1, 1], [], []>} : vector<32x32xbf16>, vector<32x64xbf16>, vector<32x64xf32> -> vector<32x64xf32>
    %8 = arith.truncf %7 : vector<32x64xf32> to vector<32x64xbf16>
    %c0_6 = arith.constant 0 : index
    %c0_7 = arith.constant 0 : index
    %c0_8 = arith.constant 0 : index
    %9 = vector.load %arg8[%c0_6, %c0_7, %c0_8] : memref<1x32x64xbf16, #tpu.memory_space<vmem>>, vector<1x32x64xbf16>
    %10 = vector.shape_cast %9 : vector<1x32x64xbf16> to vector<32x64xbf16>
    %cst_9 = arith.constant dense<0.000000e+00> : vector<32x64xf32>
    %11 = tpu.matmul %4, %10, %cst_9 {dimension_numbers = #tpu.dot_dimension_numbers<[1], [0], [0], [1], [0, 0, 1, 1], [], []>} : vector<32x32xbf16>, vector<32x64xbf16>, vector<32x64xf32> -> vector<32x64xf32>
    %12 = arith.truncf %11 : vector<32x64xf32> to vector<32x64xbf16>
    %c0_10 = arith.constant 0 : index
    %c0_11 = arith.constant 0 : index
    %13 = vector.load %arg12[%c0_10, %c0_11] : memref<64x64xbf16, #tpu.memory_space<vmem>>, vector<64x64xbf16>
    %cst_12 = arith.constant dense<0.000000e+00> : vector<64x32xf32>
    %14 = tpu.matmul %13, %8, %cst_12 {dimension_numbers = #tpu.dot_dimension_numbers<[1], [1], [0], [0], [0, 0, 1, 0], [], []>} : vector<64x64xbf16>, vector<32x64xbf16>, vector<64x32xf32> -> vector<64x32xf32>
    %c0_13 = arith.constant 0 : index
    %c0_14 = arith.constant 0 : index
    %15 = vector.load %arg15[%c0_13, %c0_14] : memref<64x1xf32, #tpu.memory_space<vmem>>, vector<64x1xf32>
    %cst_15 = arith.constant dense<0xFF800000> : vector<64xf32>
    %16 = vector.multi_reduction <maximumf>, %14, %cst_15 [1] : vector<64x32xf32> to vector<64xf32>
    %17 = vector.shape_cast %16 : vector<64xf32> to vector<64x1xf32>
    %18 = arith.maximumf %15, %17 : vector<64x1xf32>
    %c0_16 = arith.constant 0 : index
    %c0_17 = arith.constant 0 : index
    %19 = vector.load %arg15[%c0_16, %c0_17] : memref<64x1xf32, #tpu.memory_space<vmem>>, vector<64x1xf32>
    %20 = arith.subf %19, %18 : vector<64x1xf32>
    %21 = math.exp %20 : vector<64x1xf32>
    %22 = vector.broadcast %18 : vector<64x1xf32> to vector<64x32xf32>
    %23 = arith.subf %14, %22 : vector<64x32xf32>
    %24 = math.exp %23 : vector<64x32xf32>
    %c0_18 = arith.constant 0 : index
    %c0_19 = arith.constant 0 : index
    %25 = vector.load %arg16[%c0_18, %c0_19] : memref<64x1xf32, #tpu.memory_space<vmem>>, vector<64x1xf32>
    %26 = arith.mulf %21, %25 : vector<64x1xf32>
    %cst_20 = arith.constant dense<0.000000e+00> : vector<64xf32>
    %27 = vector.multi_reduction <add>, %24, %cst_20 [1] : vector<64x32xf32> to vector<64xf32>
    %28 = vector.shape_cast %27 : vector<64xf32> to vector<64x1xf32>
    %29 = arith.addf %26, %28 : vector<64x1xf32>
    %c0_21 = arith.constant 0 : index
    %c0_22 = arith.constant 0 : index
    %30 = vector.load %arg16[%c0_21, %c0_22] : memref<64x1xf32, #tpu.memory_space<vmem>>, vector<64x1xf32>
    tpu.vector_store %arg16[%c0_21, %c0_22], %29 {strides = array<i32>} : memref<64x1xf32, #tpu.memory_space<vmem>>, vector<64x1xf32>,
    %c0_23 = arith.constant 0 : index
    %c0_24 = arith.constant 0 : index
    %31 = vector.load %arg13[%c0_23, %c0_24] : memref<64x64xf32, #tpu.memory_space<vmem>>, vector<64x64xf32>
    %32 = vector.broadcast %21 : vector<64x1xf32> to vector<64x64xf32>
    %33 = arith.mulf %32, %31 : vector<64x64xf32>
    %34 = arith.truncf %24 : vector<64x32xf32> to vector<64x32xbf16>
    %cst_25 = arith.constant dense<0.000000e+00> : vector<64x64xf32>
    %35 = tpu.matmul %34, %12, %cst_25 {dimension_numbers = #tpu.dot_dimension_numbers<[1], [0], [0], [1], [0, 0, 1, 1], [], []>} : vector<64x32xbf16>, vector<32x64xbf16>, vector<64x64xf32> -> vector<64x64xf32>
    %36 = arith.addf %33, %35 : vector<64x64xf32>
    %c0_26 = arith.constant 0 : index
    %c0_27 = arith.constant 0 : index
    %37 = vector.load %arg13[%c0_26, %c0_27] : memref<64x64xf32, #tpu.memory_space<vmem>>, vector<64x64xf32>
    tpu.vector_store %arg13[%c0_26, %c0_27], %36 {strides = array<i32>} : memref<64x64xf32, #tpu.memory_space<vmem>>, vector<64x64xf32>,
    %c0_28 = arith.constant 0 : index
    %c0_29 = arith.constant 0 : index
    %38 = vector.load %arg15[%c0_28, %c0_29] : memref<64x1xf32, #tpu.memory_space<vmem>>, vector<64x1xf32>
    tpu.vector_store %arg15[%c0_28, %c0_29], %18 {strides = array<i32>} : memref<64x1xf32, #tpu.memory_space<vmem>>, vector<64x1xf32>,
    %c1_i32 = arith.constant 1 : i32
    %39 = arith.cmpi eq, %arg3, %c1_i32 : i32
    %40 = arith.extui %39 : i1 to i32
    %c0_i32_30 = arith.constant 0 : i32
    %41 = arith.cmpi ne, %40, %c0_i32_30 : i32
    scf.if %41 {
      %c0_31 = arith.constant 0 : index
      %c0_32 = arith.constant 0 : index
      %42 = vector.load %arg13[%c0_31, %c0_32] : memref<64x64xf32, #tpu.memory_space<vmem>>, vector<64x64xf32>
      %c0_33 = arith.constant 0 : index
      %c0_34 = arith.constant 0 : index
      %43 = vector.load %arg16[%c0_33, %c0_34] : memref<64x1xf32, #tpu.memory_space<vmem>>, vector<64x1xf32>
      %44 = tpu.reciprocal %43 {approx = true} : vector<64x1xf32> -> vector<64x1xf32>
      %45 = vector.broadcast %44 : vector<64x1xf32> to vector<64x64xf32>
      %46 = arith.mulf %42, %45 : vector<64x64xf32>
      %47 = arith.truncf %46 : vector<64x64xf32> to vector<64x64xbf16>
      %c0_35 = arith.constant 0 : index
      %c0_36 = arith.constant 0 : index
      %c0_37 = arith.constant 0 : index
      %48 = vector.load %arg9[%c0_35, %c0_36, %c0_37] : memref<1x64x64xbf16, #tpu.memory_space<vmem>>, vector<1x64x64xbf16>
      %49 = vector.shape_cast %48 : vector<1x64x64xbf16> to vector<64x64xbf16>
      %cst_38 = arith.constant dense<0.000000e+00> : vector<64x64xf32>
      %50 = tpu.matmul %47, %49, %cst_38 {dimension_numbers = #tpu.dot_dimension_numbers<[1], [0], [0], [1], [0, 0, 1, 1], [], []>} : vector<64x64xbf16>, vector<64x64xbf16>, vector<64x64xf32> -> vector<64x64xf32>
      %c0_i32_39 = arith.constant 0 : i32
      %51 = arith.cmpi eq, %arg2, %c0_i32_39 : i32
      %52 = arith.extui %51 : i1 to i32
      %c0_i32_40 = arith.constant 0 : i32
      %53 = arith.cmpi ne, %52, %c0_i32_40 : i32
      scf.if %53 {
        %c0_45 = arith.constant 0 : index
        %c0_46 = arith.constant 0 : index
        %60 = vector.load %arg14[%c0_45, %c0_46] : memref<64x64xf32, #tpu.memory_space<vmem>>, vector<64x64xf32>
        tpu.vector_store %arg14[%c0_45, %c0_46], %50 {strides = array<i32>} : memref<64x64xf32, #tpu.memory_space<vmem>>, vector<64x64xf32>,
      } else {
      }
      %c0_i32_41 = arith.constant 0 : i32
      %54 = arith.cmpi sgt, %arg2, %c0_i32_41 : i32
      %55 = arith.extui %54 : i1 to i32
      %c0_i32_42 = arith.constant 0 : i32
      %56 = arith.cmpi ne, %55, %c0_i32_42 : i32
      scf.if %56 {
        %c0_45 = arith.constant 0 : index
        %c0_46 = arith.constant 0 : index
        %60 = vector.load %arg14[%c0_45, %c0_46] : memref<64x64xf32, #tpu.memory_space<vmem>>, vector<64x64xf32>
        %61 = arith.addf %60, %50 : vector<64x64xf32>
        %c0_47 = arith.constant 0 : index
        %c0_48 = arith.constant 0 : index
        %62 = vector.load %arg14[%c0_47, %c0_48] : memref<64x64xf32, #tpu.memory_space<vmem>>, vector<64x64xf32>
        tpu.vector_store %arg14[%c0_47, %c0_48], %61 {strides = array<i32>} : memref<64x64xf32, #tpu.memory_space<vmem>>, vector<64x64xf32>,
      } else {
      }
      %c1_i32_43 = arith.constant 1 : i32
      %57 = arith.cmpi eq, %arg2, %c1_i32_43 : i32
      %58 = arith.extui %57 : i1 to i32
      %c0_i32_44 = arith.constant 0 : i32
      %59 = arith.cmpi ne, %58, %c0_i32_44 : i32
      scf.if %59 {
        %c0_45 = arith.constant 0 : index
        %c0_46 = arith.constant 0 : index
        %60 = vector.load %arg14[%c0_45, %c0_46] : memref<64x64xf32, #tpu.memory_space<vmem>>, vector<64x64xf32>
        %c0_47 = arith.constant 0 : index
        %c0_48 = arith.constant 0 : index
        %61 = vector.load %arg10[%c0_47, %c0_48] : memref<1x64xf32, #tpu.memory_space<vmem>>, vector<1x64xf32>
        %62 = vector.broadcast %61 : vector<1x64xf32> to vector<64x64xf32>
        %63 = arith.addf %60, %62 : vector<64x64xf32>
        %c0_49 = arith.constant 0 : index
        %c0_50 = arith.constant 0 : index
        %c0_51 = arith.constant 0 : index
        %64 = vector.load %arg11[%c0_49, %c0_50, %c0_51] : memref<1x64x64xf32, #tpu.memory_space<vmem>>, vector<1x64x64xf32>
        %65 = vector.shape_cast %64 : vector<1x64x64xf32> to vector<64x64xf32>
        %66 = vector.shape_cast %63 : vector<64x64xf32> to vector<1x64x64xf32>
        tpu.vector_store %arg11[%c0_49, %c0_50, %c0_51], %66 {strides = array<i32>} : memref<1x64x64xf32, #tpu.memory_space<vmem>>, vector<1x64x64xf32>,
      } else {
      }
    } else {
    }
    return
  }
  func.func @transform_0(%arg0: i32, %arg1: i32, %arg2: i32, %arg3: i32) -> (i32, i32, i32) {
    %c0_i32 = arith.constant 0 : i32
    %c0_i32_0 = arith.constant 0 : i32
    return %arg0, %arg1, %c0_i32 : i32, i32, i32
  }
  func.func @transform_1(%arg0: i32, %arg1: i32, %arg2: i32, %arg3: i32) -> (i32, i32, i32) {
    %c0_i32 = arith.constant 0 : i32
    %c0_i32_0 = arith.constant 0 : i32
    return %arg0, %arg3, %c0_i32 : i32, i32, i32
  }
  func.func @transform_2(%arg0: i32, %arg1: i32, %arg2: i32, %arg3: i32) -> (i32, i32, i32) {
    %c0_i32 = arith.constant 0 : i32
    %c0_i32_0 = arith.constant 0 : i32
    %c0_i32_1 = arith.constant 0 : i32
    return %arg2, %c0_i32, %c0_i32_0 : i32, i32, i32
  }
  func.func @transform_3(%arg0: i32, %arg1: i32, %arg2: i32, %arg3: i32) -> (i32, i32, i32) {
    %c0_i32 = arith.constant 0 : i32
    %c0_i32_0 = arith.constant 0 : i32
    %c0_i32_1 = arith.constant 0 : i32
    return %arg2, %c0_i32, %c0_i32_0 : i32, i32, i32
  }
  func.func @transform_4(%arg0: i32, %arg1: i32, %arg2: i32, %arg3: i32) -> (i32, i32, i32) {
    %c0_i32 = arith.constant 0 : i32
    %c0_i32_0 = arith.constant 0 : i32
    %c0_i32_1 = arith.constant 0 : i32
    return %arg2, %c0_i32, %c0_i32_0 : i32, i32, i32
  }
  func.func @transform_5(%arg0: i32, %arg1: i32, %arg2: i32, %arg3: i32) -> (i32, i32, i32) {
    %c0_i32 = arith.constant 0 : i32
    %c0_i32_0 = arith.constant 0 : i32
    %c0_i32_1 = arith.constant 0 : i32
    return %arg2, %c0_i32, %c0_i32_0 : i32, i32, i32
  }
  func.func @transform_6(%arg0: i32, %arg1: i32, %arg2: i32, %arg3: i32) -> (i32, i32) {
    %c0_i32 = arith.constant 0 : i32
    %c0_i32_0 = arith.constant 0 : i32
    %c0_i32_1 = arith.constant 0 : i32
    return %c0_i32, %c0_i32_0 : i32, i32
  }
  func.func @transform_7(%arg0: i32, %arg1: i32, %arg2: i32, %arg3: i32) -> (i32, i32, i32) {
    %c0_i32 = arith.constant 0 : i32
    %c0_i32_0 = arith.constant 0 : i32
    return %arg0, %arg1, %c0_i32 : i32, i32, i32
  }
}

</mosaic_0001>

<bundles_post_ra>
// kernel: tpu_custom_call.1
= control target key start
LH: loop header
LB: loop body
LE: loop exit
PB: predicated region body
PF: predicated region fallthrough
CT: control target
= control target key end

     0   :  { %s2105_s24 = smov 0   ;;  %s2107_s25 = smov 0   ;;  %s2467_s0 = inlined_call_operand.vmem [shape: bf16[2,128,64], index: 0, kind: input, shape index: {}]   ;;  %s2468_s1 = inlined_call_operand.vmem [shape: bf16[2,64,32], index: 1, kind: input, shape index: {}]   ;;  %s2469_s2 = inlined_call_operand.vmem [shape: bf16[2,64,64], index: 2, kind: input, shape index: {}]   ;;  %s2470_s3 = inlined_call_operand.vmem [shape: bf16[2,32,64], index: 3, kind: input, shape index: {}]   ;;  %s2471_s4 = inlined_call_operand.vmem [shape: bf16[2,32,64], index: 4, kind: input, shape index: {}]   ;;  %s2472_s5 = inlined_call_operand.vmem [shape: bf16[2,64,64], index: 5, kind: input, shape index: {}]   ;;  %s2473_s6 = inlined_call_operand.vmem [shape: f32[1,64], index: 6, kind: input, shape index: {}]   ;;  %s2474_s7 = inlined_call_operand.vmem [shape: f32[2,128,64], index: 7, kind: output, shape index: {}]  }
   0x1   :  { %s2109_s26 = smov 0   ;;  %s2111_s27 = smov 0  }
   0x2   :  { %s2113_s28 = smov 0   ;;  %s2115_s29 = smov 0  }
   0x3   :  { %s2117_s30 = smov 0   ;;  %s2119_s8 = smov 0  }
   0x4   :  { %s2121_s9 = smov 0  }
   0x5 LB: > { %2478 = sst [smem:[#allocation7_spill]] %s2047_s29  ;;  %s32_s10 = sadd.s32 1, %s2043_s28  ;;  %s2059_s9 = sphi %s2121_s9, %s17_s9   ;;  %s2055_s8 = sphi %s2119_s8, %s2491_s8   ;;  %s2051_s30 = sphi %s2117_s30, %s2494_s30   ;;  %s2047_s29 = sphi %s2115_s29, %s2489_s29   ;;  %s2043_s28 = sphi %s2113_s28, %s2493_s28   ;;  %s2039_s27 = sphi %s2111_s27, %s2487_s27   ;;  %s2035_s26 = sphi %s2109_s26, %s2486_s26   ;;  %s2031_s25 = sphi %s2107_s25, %s2485_s25   ;;  %s2027_s24 = sphi %s2105_s24, %s2492_s24  }
   0x6   : > { %2479 = sst [smem:[#allocation8_spill]] %s2051_s30  ;;  %p33_p0 = scmp.ge.s32.totalorder %s32_s10, 2 }
   0x7   : > { %2480 = sst [smem:[#allocation9_spill]] %s2055_s8  ;;  %s35_s11 = sadd.s32 1, %s2047_s29 }
   0x8   : > { %p1649_p1 = scmp.ge.s32.totalorder %s2059_s9, 1  ;;  %s2496_s10 = smov (%p33_p0, %s32_s10), 0 }
   0x9   : > { %2481 = sst [smem:[#allocation10_spill]] %s2496_s10  ;;  %s2498_s11 = smov (!%p33_p0, %s35_s11), %s2047_s29 }
   0xa   : > { %p329_p2 = scmp.lt.s32.totalorder %s2059_s9, 17  ;;  %p37_p3 = scmp.ge.s32.totalorder %s2498_s11, 2 }
   0xb   : > { %s39_s12 = sadd.s32 1, %s2051_s30  ;;  %s43_s13 = sadd.s32 1, %s2055_s8 }
   0xc   : > { %p330_p4 = pnand %p1649_p1, %p329_p2  ;;  %s2500_s11 = smov (%p37_p3, %s2498_s11), 0 }
   0xd   : > { %2482 = sst [smem:[#allocation11_spill]] %s2500_s11  ;;  %s2502_s12 = smov (!%p37_p3, %s39_s12), %s2051_s30 }
   0xe   : > { %p41_p5 = scmp.ge.s32.totalorder %s2502_s12, 2  ;;  %333 = sbr.rel (%p330_p4) target bundleno = 1580 (0x62c), region = 48 }
   0xf   : > { %s1650_s14 = sshll.u32 (!%p330_p4), %s2035_s26, 3  ;;  %p399_p7 = scmp.lt.s32.totalorder (!%p330_p4), %s2039_s27, 1 }
  0x10   : > { %s2504_s12 = smov (%p41_p5, %s2502_s12), 0  ;;  %s2506_s13 = smov (!%p41_p5, %s43_s13), %s2055_s8 }
  0x11   : > { %2483 = sst [smem:[#allocation12_spill]] %s2504_s12  ;;  %p45_p6 = scmp.ge.s32.totalorder %s2506_s13, 2 }
  0x12   : > { %p401_p8 = scmp.lt.s32.totalorder (!%p330_p4), %s1650_s14, 15  ;;  %s1653_s15 = sshll.u32 (!%p330_p4), %s2027_s24, 2 }
  0x13   : > { %s2508_s13 = smov (%p45_p6, %s2506_s13), 0  ;;  %p411_p9 = scmp.lt.s32.totalorder (!%p330_p4), %s1653_s15, 7 }
  0x14   : > { %2484 = sst [smem:[#allocation13_spill]] %s2508_s13  ;;  %p418_p10 = scmp.lt.s32.totalorder (!%p330_p4), %s2031_s25, 1 }
  0x15   : > { %s2510_s27 = smov (!%p399_p7, %s2039_s27), 1  ;;  %s2512_s14 = smov (!%p401_p8, %s1650_s14), 15 }
  0x16   : > { %s1651_s16 = sshll.u32 %s2510_s27, 4  ;;  %s1654_s18 = sshll.u32 %s2510_s27, 3 }
  0x17   : > { %s404_s17 = sadd.s32 %s1651_s16, %s2512_s14  ;;  %s2514_s15 = smov (!%p411_p9, %s1653_s15), 7 }
  0x18   : > { %s1652_s19 = sshll.u32 %s404_s17, 2  ;;  %s1666_s23 = sshll.u32 %s404_s17, 3 }
  0x19   : > { %s2171_s22 = scalar_lea.vmem %s2467_s0, %s1652_s19  ;;  %s414_s26 = sadd.s32 %s1654_s18, %s2514_s15 }
  0x1a   : > { %s419_s13 = scalar_select %p418_p10, %s2031_s25, 1 }
  0x1b   : > { %s2177_s10 = scalar_lea.vmem %s2474_s7, %s1666_s23  ;;  %s1655_s8 = sshll.u32 %s414_s26, 2 }
  0x1c   : > { %s1713_s30 = sshll.u32 %s419_s13, 5  ;;  %s2182_s16 = scalar_lea.vmem %s2468_s1, %s1655_s8 }
  0x1d   : > { %s2187_s19 = scalar_lea.vmem %s2469_s2, %s1713_s30  ;;  %s1714_s17 = sshll.u32 %s419_s13, 4 }
  0x1e   : > { %s2192_s18 = scalar_lea.vmem %s2472_s5, %s1713_s30  ;;  %s2197_s23 = scalar_lea.vmem %s2470_s3, %s1714_s17 }
  0x1f   : > { %s2202_s8 = scalar_lea.vmem %s2471_s4, %s1714_s17  ;;  %p1667_p11 = scmp.ne.s32.totalorder %s2027_s24, 0 }
  0x20   : > { %v1919_v0 = vld [vmem:[%s2187_s19] sm:$0xff] (!%p1667_p11)   ;;  %v1920_v1 = vld [vmem:[%s2187_s19 + $0x8] sm:$0xff] (!%p1667_p11)   ;;  %vm599_vm0 = vcmask (!%p1667_p11), 7168   ;;  %vm513_vm1 = vcmask (!%p1667_p11), 523264   ;;  %v1921_v2 = vld [vmem:[%s2187_s19 + $0x10] sm:$0xff] (!%p1667_p11)   ;;  %v2061_v3 = vmov (!%p1667_p11), -inf  }
  0x21   : > { %452 = sbr.rel (%p1667_p11) target bundleno = 267 (0x10b), region = 52  ;;  %1753 = vmatprep.subr.bf16.mxu0 (!%p1667_p11), %v1919_v0  ;;  %1825 = vmatprep.subr.bf16.mxu1 (!%p1667_p11), %v1919_v0  ;;  %600 = vst.msk [vmem:[#allocation5] sm:$0xff] (!%p1667_p11), %vm599_vm0, %v2061_v3  ;;  %601 = vst.msk [vmem:[#allocation5 + $0x8] sm:$0xff] (!%p1667_p11), %vm599_vm0, %v2061_v3  ;;  %v1923_v4 = vld [vmem:[%s2171_s22] sm:$0xff] (!%p1667_p11)   ;;  %v2062_v5 = vmov (!%p1667_p11), 0.0   ;;  %v1924_v6 = vld [vmem:[%s2171_s22 + $0x10] sm:$0xff] (!%p1667_p11)  }
  0x22   : > { %1754 = vmatpush3.bf16.msra.mxu0 (!%p1667_p11), %v1919_v0  ;;  %1829 = vmatpush3.bf16.msra.mxu1 (!%p1667_p11), %v1919_v0  ;;  %602 = vst.msk [vmem:[#allocation5 + $0x10] sm:$0xff] (!%p1667_p11), %vm599_vm0, %v2061_v3  ;;  %603 = vst.msk [vmem:[#allocation5 + $0x18] sm:$0xff] (!%p1667_p11), %vm599_vm0, %v2061_v3  ;;  %v1922_v7 = vld [vmem:[%s2187_s19 + $0x18] sm:$0xff] (!%p1667_p11)   ;;  %v1925_v8 = vld [vmem:[%s2171_s22 + $0x8] sm:$0xff] (!%p1667_p11)  }
  0x23   : > { %604 = vst.msk [vmem:[#allocation5 + $0x20] sm:$0xff] (!%p1667_p11), %vm599_vm0, %v2061_v3  ;;  %605 = vst.msk [vmem:[#allocation5 + $0x28] sm:$0xff] (!%p1667_p11), %vm599_vm0, %v2061_v3  ;;  %1755 = vmatprep.subr.bf16.mxu0 (!%p1667_p11), %v1920_v1  ;;  %1826 = vmatprep.subr.bf16.mxu1 (!%p1667_p11), %v1920_v1  ;;  %v1926_v9 = vld [vmem:[%s2171_s22 + $0x18] sm:$0xff] (!%p1667_p11)  }
  0x24   : > { %606 = vst.msk [vmem:[#allocation5 + $0x30] sm:$0xff] (!%p1667_p11), %vm599_vm0, %v2061_v3  ;;  %607 = vst.msk [vmem:[#allocation5 + $0x38] sm:$0xff] (!%p1667_p11), %vm599_vm0, %v2061_v3  ;;  %1761 = vmatprep.mubr.msk.bf16.mxu0 (!%p1667_p11), %vm513_vm1, %v1923_v4  ;;  %1765 = vmatprep.mubr.msk.bf16.mxu1 (!%p1667_p11), %vm513_vm1, %v1924_v6 }
  0x25   : > { %608 = vst.msk [vmem:[#allocation6] sm:$0xff] (!%p1667_p11), %vm599_vm0, %v2062_v5  ;;  %609 = vst.msk [vmem:[#allocation6 + $0x8] sm:$0xff] (!%p1667_p11), %vm599_vm0, %v2062_v5 }
  0x26   : > { %610 = vst.msk [vmem:[#allocation6 + $0x10] sm:$0xff] (!%p1667_p11), %vm599_vm0, %v2062_v5  ;;  %611 = vst.msk [vmem:[#allocation6 + $0x18] sm:$0xff] (!%p1667_p11), %vm599_vm0, %v2062_v5  ;;  %1756 = vmatpush3.bf16.msra.mxu0 (!%p1667_p11), %v1920_v1  ;;  %1830 = vmatpush3.bf16.msra.mxu1 (!%p1667_p11), %v1920_v1 }
  0x27   : > { %612 = vst.msk [vmem:[#allocation6 + $0x20] sm:$0xff] (!%p1667_p11), %vm599_vm0, %v2062_v5  ;;  %613 = vst.msk [vmem:[#allocation6 + $0x28] sm:$0xff] (!%p1667_p11), %vm599_vm0, %v2062_v5  ;;  %1757 = vmatprep.subr.bf16.mxu0 (!%p1667_p11), %v1921_v2  ;;  %1827 = vmatprep.subr.bf16.mxu1 (!%p1667_p11), %v1921_v2 }
  0x28   : > { %614 = vst.msk [vmem:[#allocation6 + $0x30] sm:$0xff] %vm599_vm0, %v2062_v5  ;;  %615 = vst.msk [vmem:[#allocation6 + $0x38] sm:$0xff] %vm599_vm0, %v2062_v5 }
  0x29   : > { %616 = vst.msk [vmem:[#allocation3] sm:$0xff] %vm513_vm1, %v2062_v5  ;;  %617 = vst.msk [vmem:[#allocation3 + $0x8] sm:$0xff] %vm513_vm1, %v2062_v5 }
  0x2a   : > { %618 = vst.msk [vmem:[#allocation3 + $0x10] sm:$0xff] %vm513_vm1, %v2062_v5  ;;  %619 = vst.msk [vmem:[#allocation3 + $0x18] sm:$0xff] %vm513_vm1, %v2062_v5  ;;  %1758 = vmatpush3.bf16.msra.mxu0 %v1921_v2  ;;  %1831 = vmatpush3.bf16.msra.mxu1 %v1921_v2 }
  0x2b   : > { %620 = vst.msk [vmem:[#allocation3 + $0x20] sm:$0xff] %vm513_vm1, %v2062_v5  ;;  %621 = vst.msk [vmem:[#allocation3 + $0x28] sm:$0xff] %vm513_vm1, %v2062_v5  ;;  %1759 = vmatprep.subr.bf16.mxu0 %v1922_v7  ;;  %1828 = vmatprep.subr.bf16.mxu1 %v1922_v7 }
  0x2c   : > { %622 = vst.msk [vmem:[#allocation3 + $0x30] sm:$0xff] %vm513_vm1, %v2062_v5  ;;  %623 = vst.msk [vmem:[#allocation3 + $0x38] sm:$0xff] %vm513_vm1, %v2062_v5 }
  0x2e   : > { %1760 = vmatpush3.bf16.msra.mxu0 %v1922_v7  ;;  %1832 = vmatpush3.bf16.msra.mxu1 %v1922_v7 }
  0x31   : > { %1762 = vmatmul.mubr.msk.bf16.vlgmr.msra.gmra.mrb[0].mxu0 %vm513_vm1, %v1925_v8  ;;  %1766 = vmatmul.mubr.msk.bf16.vlgmr.msra.gmra.mrb[0].mxu1 %vm513_vm1, %v1926_v9 }
 0x104   : > { %v1763_v10 = vpop.f32.mrb[0].mxu0  ;;  %v1767_v11 = vpop.f32.mrb[0].mxu1 }
 0x105   : > { %v560_v12 = vpop.f32.mrb[1].mxu0  ;;  %v576_v13 = vpop.f32.mrb[1].mxu1 }
 0x106   : > { %v1764_v14 = vpop.f32.mrb[2].mxu0  ;;  %v1768_v15 = vpop.f32.mrb[2].mxu1 }
 0x107   : > { %v592_v16 = vpack.c.bf16 %v1764_v14, %v1763_v10  ;;  %v594_v17 = vpack.c.bf16 %v1768_v15, %v1767_v11  ;;  %v563_v18 = vpop.f32.mrb[3].mxu0  ;;  %v579_v19 = vpop.f32.mrb[3].mxu1 }
 0x108   : > { %v591_v20 = vpack.c.bf16 %v563_v18, %v560_v12  ;;  %v593_v21 = vpack.c.bf16 %v579_v19, %v576_v13 }
 0x109   : > { %596 = vst.msk [vmem:[#allocation2 + $0x8] sm:$0xff] %vm513_vm1, %v592_v16  ;;  %598 = vst.msk [vmem:[#allocation2 + $0x18] sm:$0xff] %vm513_vm1, %v594_v17 }
 0x10a   : > { %595 = vst.msk [vmem:[#allocation2] sm:$0xff] %vm513_vm1, %v591_v20  ;;  %597 = vst.msk [vmem:[#allocation2 + $0x10] sm:$0xff] %vm513_vm1, %v593_v21 }
 0x10b PF: > { %v1929_v22 = vld [vmem:[%s2197_s23] sm:$0xff]   ;;  %v1930_v23 = vld [vmem:[%s2197_s23 + $0x8] sm:$0xff]   ;;  %vm654_vm2 = vcmask 261120   ;;  %vm783_vm3 = vcmask 523264   ;;  %v2063_v56 = vmov 0   ;;  %vm1043_vm4 = vcmask 7168  }
 0x10c   : > { %1769 = vmatprep.subr.bf16.mxu0 %v1929_v22  ;;  %v1931_v24 = vld [vmem:[%s2182_s16] sm:$0xff]   ;;  %v1932_v25 = vld [vmem:[%s2182_s16 + $0x8] sm:$0xff]   ;;  %1927 = vset.pattern.permute.xlu0 %v2063_v56  ;;  %v869_v57 = vld [vmem:[#allocation5 + $0x10] sm:$0xff]  ;;  %p1698_p12 = scmp.ne.s32.totalorder %s2027_s24, 1 }
 0x10d   : > { %1770 = vmatpush3.bf16.msra.mxu0 %v1929_v22  ;;  %1773 = vmatprep.mubr.msk.bf16.mxu0 %vm654_vm2, %v1931_v24  ;;  %v1933_v38 = vld [vmem:[%s2202_s8] sm:$0xff]   ;;  %v1934_v39 = vld [vmem:[%s2202_s8 + $0x8] sm:$0xff]   ;;  %v870_v63 = vld [vmem:[#allocation5 + $0x18] sm:$0xff]  ;;  %p1707_p13 = scmp.ne.s32.totalorder (!%p1698_p12), %s2031_s25, 0 }
 0x10e   : > { %1771 = vmatprep.subr.bf16.mxu0 %v1930_v23  ;;  %1781 = vmatprep.mubr.msk.bf16.mxu1 %vm654_vm2, %v1931_v24  ;;  %v867_v58 = vld [vmem:[#allocation5] sm:$0xff]  ;;  %v868_v0 = vld [vmem:[#allocation5 + $0x8] sm:$0xff]  ;;  %v2299_v14 = vld [vmem:[#allocation5 + $0x30] sm:$0xff] }
 0x10f   : > { %1777 = vmatprep.subr.bf16.mxu1 %v1933_v38  ;;  %1928 = vset.pattern.permute.xlu1 %v2063_v56  ;;  %v871_v8 = vld [vmem:[#allocation5 + $0x20] sm:$0xff]  ;;  %v872_v11 = vld [vmem:[#allocation5 + $0x28] sm:$0xff]  ;;  %v2302_v18 = vld [vmem:[#allocation5 + $0x38] sm:$0xff] }
 0x110   : > { %v780_v35 = vld [vmem:[#allocation2 + $0x8] sm:$0xff]  ;;  %v782_v37 = vld [vmem:[#allocation2 + $0x18] sm:$0xff]  ;;  %1778 = vmatpush3.bf16.msra.mxu1 %v1933_v38 }
 0x111   : > { %1772 = vmatpush3.bf16.msra.mxu0 %v1930_v23  ;;  %v779_v26 = vld [vmem:[#allocation2] sm:$0xff]  ;;  %v781_v36 = vld [vmem:[#allocation2 + $0x10] sm:$0xff]  ;;  %1779 = vmatprep.subr.bf16.mxu1 %v1934_v39 }
 0x114   : > { %1774 = vmatmul.mubr.msk.bf16.vlgmr.msra.gmra.mrb[0].mxu0 %vm654_vm2, %v1932_v25  ;;  %1780 = vmatpush3.bf16.msra.mxu1 %v1934_v39 }
 0x115   : > { %1789 = vmatprep.mubr.msk.bf16.mxu0 %vm783_vm3, %v779_v26 }
 0x117   : > { %1782 = vmatmul.mubr.msk.bf16.vlgmr.msra.gmra.mrb[0].mxu1 %vm654_vm2, %v1932_v25 }
 0x1e7   : > { %v1775_v27 = vpop.f32.mrb[0].mxu0 }
 0x1e8   : > { %v695_v28 = vpop.f32.mrb[1].mxu0 }
 0x1e9   : > { %v1776_v29 = vpop.f32.mrb[2].mxu0 }
 0x1ea   : > { %v711_v30 = vpack.c.bf16 %v1776_v29, %v1775_v27  ;;  %v698_v31 = vpop.f32.mrb[3].mxu0  ;;  %v1783_v22 = vpop.f32.mrb[0].mxu1 }
 0x1eb   : > { %v710_v32 = vpack.c.bf16 %v698_v31, %v695_v28  ;;  %v762_v26 = vpop.f32.mrb[1].mxu1 }
 0x1ec   : > { %v800_v34 = vsel %vm783_vm3, %v711_v30, 0  ;;  %v1784_v29 = vpop.f32.mrb[2].mxu1 }
 0x1ed   : > { %v797_v33 = vsel %vm783_vm3, %v710_v32, 0  ;;  %1841 = vmatprep.subr.msk.bf16.mxu0 %vm783_vm3, %v710_v32  ;;  %v765_v32 = vpop.f32.mrb[3].mxu1 }
 0x1ee   : > { %1786 = vmatpush3.bf16.xpose.msra.mxu0 %v797_v33  ;;  %v777_v33 = vpack.c.bf16 %v765_v32, %v762_v26 }
 0x1ef   : > { %1842 = vmatprep.subr.msk.bf16.mxu0 %vm783_vm3, %v711_v30 }
 0x1f0   : > { %1797 = vmatprep.subr.bf16.mxu1 %v777_v33 }
 0x1f1   : > { %1798 = vmatpush3.bf16.msra.mxu1 %v777_v33 }
 0x1f6   : > { %1788 = vmatpush3.bf16.xpose.msra.mxu0 %v800_v34  ;;  %v778_v34 = vpack.c.bf16 %v1784_v29, %v1783_v22 }
 0x1f8   : > { %1799 = vmatprep.subr.bf16.mxu1 %v778_v34 }
 0x1f9   : > { %1800 = vmatpush3.bf16.msra.mxu1 %v778_v34 }
 0x1fd   : > { %1790 = vmatmul.mubr.msk.bf16.vlgmr.msra.gmra.mrb[4].mxu0 %vm783_vm3, %v780_v35 }
 0x1fe   : > { %1793 = vmatprep.mubr.msk.bf16.mxu0 %vm783_vm3, %v781_v36 }
 0x205   : > { %1794 = vmatmul.mubr.msk.bf16.gmra.mrb[8].mxu0 %vm783_vm3, %v782_v37 }
 0x2d0   : > { %v2263_v40 = vpop.f32.mrb[4].mxu0 }
 0x2d1   : > { %v2265_v41 = vpop.f32.mrb[5].mxu0  ;;  %v881_v42 = vsel %vm654_vm2, %v2263_v40, -inf }
 0x2d2   : > { %882 = vmax.xlane.f32.xlu1 %v881_v42  ;;  %v2269_v43 = vpop.f32.mrb[6].mxu0  ;;  %v875_v44 = vsel %vm654_vm2, %v2265_v41, -inf }
 0x2d3   : > { %876 = vmax.xlane.f32.xlu0 %v875_v44  ;;  %v2273_v45 = vpop.f32.mrb[7].mxu0  ;;  %v884_v46 = vsel %vm654_vm2, %v2269_v43, -inf }
 0x2d4   : > { %v878_v47 = vsel %vm654_vm2, %v2273_v45, -inf }
 0x2d6   : > { %885 = vmax.xlane.f32.xlu1 %v884_v46 }
 0x2d7   : > { %879 = vmax.xlane.f32.xlu0 %v878_v47 }
 0x2d8   : > { %v2279_v48 = vpop.f32.mrb[8].mxu0 }
 0x2d9   : > { %v2281_v49 = vpop.f32.mrb[9].mxu0  ;;  %v893_v54 = vsel %vm654_vm2, %v2279_v48, -inf }
 0x2da   : > { %v2283_v50 = vpop.f32.mrb[10].mxu0  ;;  %v887_v51 = vsel %vm654_vm2, %v2281_v49, -inf }
 0x2db   : > { %888 = vmax.xlane.f32.xlu0 %v887_v51  ;;  %v2287_v52 = vpop.f32.mrb[11].mxu0  ;;  %v896_v55 = vsel %vm654_vm2, %v2283_v50, -inf }
 0x2dc   : > { %v890_v53 = vsel %vm654_vm2, %v2287_v52, -inf }
 0x2dd   : > { %891 = vmax.xlane.f32.xlu1 %v890_v53 }
 0x2df   : > { %894 = vmax.xlane.f32.xlu0 %v893_v54 }
 0x2e1   : > { %897 = vmax.xlane.f32.xlu1 %v896_v55 }
 0x35f   : > { %v883_v59 = vpop.xlane.xlu1 %882 }
 0x360   : > { %v901_v60 = vmax.f32 %v869_v57, %v883_v59  ;;  %v877_v61 = vpop.xlane.xlu0 %876 }
 0x361   : > { %v899_v62 = vmax.f32 %v867_v58, %v877_v61 }
 0x362   : > { %1207 = vst.msk [vmem:[#allocation5 + $0x10] sm:$0xff] %vm1043_vm4, %v901_v60  ;;  %943 = vperm.xlu1 %1928, %v901_v60   ;;  %v909_v16 = vsub.f32 %v869_v57, %v901_v60 }
 0x363   : > { %v907_v1 = vsub.f32 %v867_v58, %v899_v62  ;;  %1205 = vst.msk [vmem:[#allocation5] sm:$0xff] %vm1043_vm4, %v899_v62  ;;  %v886_v2 = vpop.xlane.xlu1 %885  ;;  %933 = vperm.xlu0 %1927, %v899_v62  }
 0x364   : > { %v902_v3 = vmax.f32 %v870_v63, %v886_v2  ;;  %v880_v4 = vpop.xlane.xlu0 %879  ;;  %v919_v27 = vmul.f32 1.442695, %v909_v16 }
 0x365   : > { %v915_v5 = vmul.f32 1.442695, %v907_v1  ;;  %v900_v6 = vmax.f32 %v868_v0, %v880_v4 }
 0x366   : > { %v910_v7 = vsub.f32 %v870_v63, %v902_v3  ;;  %1208 = vst.msk [vmem:[#allocation5 + $0x18] sm:$0xff] %vm1043_vm4, %v902_v3  ;;  %948 = vperm.xlu1 %1928, %v902_v3  }
 0x367   : > { %1935 = vpow2.f32 %v915_v5  ;;  %1206 = vst.msk [vmem:[#allocation5 + $0x8] sm:$0xff] %vm1043_vm4, %v900_v6  ;;  %v908_v28 = vsub.f32 %v868_v0, %v900_v6 }
 0x368   : > { %v921_v9 = vmul.f32 1.442695, %v910_v7  ;;  %v889_v10 = vpop.xlane.xlu0 %888 }
 0x369   : > { %v903_v12 = vmax.f32 %v871_v8, %v889_v10  ;;  %v917_v36 = vmul.f32 1.442695, %v908_v28 }
 0x36a   : > { %1937 = vpow2.f32 %v921_v9  ;;  %938 = vperm.xlu1 %1928, %v900_v6   ;;  %v892_v13 = vpop.xlane.xlu1 %891 }
 0x36b   : > { %1209 = vst.msk [vmem:[#allocation5 + $0x20] sm:$0xff] %vm1043_vm4, %v903_v12  ;;  %v904_v15 = vmax.f32 %v872_v11, %v892_v13  ;;  %v911_v37 = vsub.f32 %v871_v8, %v903_v12 }
 0x36c   : > { %v895_v17 = vpop.xlane.xlu0 %894 }
 0x36d   : > { %v912_v19 = vsub.f32 %v872_v11, %v904_v15  ;;  %1210 = vst.msk [vmem:[#allocation5 + $0x28] sm:$0xff] %vm1043_vm4, %v904_v15  ;;  %v2306_v20 = vmax.f32 %v2299_v14, %v895_v17  ;;  %v923_v38 = vmul.f32 1.442695, %v911_v37  ;;  %v997_v37 = vld [vmem:[#allocation6 + $0x10] sm:$0xff] }
 0x36e   : > { %v898_v21 = vpop.xlane.xlu1 %897 }
 0x36f   : > { %v925_v23 = vmul.f32 1.442695, %v912_v19  ;;  %v913_v24 = vsub.f32 %v2299_v14, %v2306_v20  ;;  %1211 = vst.msk [vmem:[#allocation5 + $0x30] sm:$0xff] %vm1043_vm4, %v2306_v20  ;;  %v2313_v25 = vmax.f32 %v2302_v18, %v898_v21  ;;  %963 = vperm.xlu1 %1928, %v2306_v20  }
 0x371   : > { %v2316_v30 = vpop.eup %1935  ;;  %1939 = vpow2.f32 %v925_v23  ;;  %v914_v31 = vsub.f32 %v2302_v18, %v2313_v25  ;;  %1212 = vst.msk [vmem:[#allocation5 + $0x38] sm:$0xff] %vm1043_vm4, %v2313_v25  ;;  %v927_v29 = vmul.f32 1.442695, %v913_v24 }
 0x372   : > { %1062 = vperm.xlu0 %1927, %v2316_v30   ;;  %1941 = vpow2.f32 %v919_v27 }
 0x373   : > { %953 = vperm.xlu1 %1928, %v903_v12   ;;  %1943 = vpow2.f32 %v917_v36 }
 0x374   : > { %v2323_v35 = vpop.eup %1937  ;;  %1945 = vpow2.f32 %v923_v38 }
 0x376   : > { %1077 = vperm.xlu0 %1927, %v2323_v35  }
 0x377   : > { %958 = vperm.xlu1 %1928, %v904_v15  }
 0x37b   : > { %v2326_v39 = vpop.eup %1939  ;;  %968 = vperm.xlu1 %1928, %v2313_v25  }
 0x37c   : > { %1087 = vperm.xlu0 %1927, %v2326_v39   ;;  %v2330_v42 = vpop.eup %1941 }
 0x37d   : > { %v2333_v44 = vpop.eup %1943 }
 0x37e   : > { %v2336_v46 = vpop.eup %1945 }
 0x37f   : > { %1072 = vperm.xlu1 %1928, %v2330_v42  }
 0x383   : > { %1067 = vperm.xlu1 %1928, %v2333_v44  }
 0x387   : > { %1082 = vperm.xlu1 %1928, %v2336_v46  }
 0x3e1   : > { %v944_v47 = vpop.permute.xlu1 %943 }
 0x3e2   : > { %v973_v51 = vsub.f32 %v2263_v40, %v944_v47  ;;  %v934_v53 = vpop.permute.xlu0 %933  ;;  %v995_v47 = vld [vmem:[#allocation6] sm:$0xff] }
 0x3e3   : > { %v971_v54 = vsub.f32 %v2265_v41, %v934_v53  ;;  %v1003_v14 = vmul.f32 %v2316_v30, %v995_v47  ;;  %v1001_v30 = vld [vmem:[#allocation6 + $0x30] sm:$0xff] }
 0x3e4   : > { %v983_v55 = vmul.f32 1.442695, %v973_v51  ;;  %v1005_v51 = vmul.f32 %v2330_v42, %v997_v37 }
 0x3e5   : > { %v979_v56 = vmul.f32 1.442695, %v971_v54  ;;  %v949_v57 = vpop.permute.xlu1 %948  ;;  %v998_v54 = vld [vmem:[#allocation6 + $0x18] sm:$0xff] }
 0x3e6   : > { %1947 = vpow2.f32 %v983_v55  ;;  %v974_v58 = vsub.f32 %v2269_v43, %v949_v57  ;;  %v996_v57 = vld [vmem:[#allocation6 + $0x8] sm:$0xff] }
 0x3e7   : > { %1949 = vpow2.f32 %v979_v56  ;;  %v1006_v56 = vmul.f32 %v2323_v35, %v998_v54 }
 0x3e8   : > { %v985_v59 = vmul.f32 1.442695, %v974_v58 }
 0x3e9   : > { %v939_v60 = vpop.permute.xlu1 %938 }
 0x3ea   : > { %1951 = vpow2.f32 %v985_v59  ;;  %v972_v61 = vsub.f32 %v2273_v45, %v939_v60  ;;  %v1004_v60 = vmul.f32 %v2333_v44, %v996_v57  ;;  %v1002_v44 = vld [vmem:[#allocation6 + $0x38] sm:$0xff] }
 0x3ec   : > { %v981_v62 = vmul.f32 1.442695, %v972_v61 }
 0x3ee   : > { %1953 = vpow2.f32 %v981_v62  ;;  %v964_v63 = vpop.permute.xlu1 %963 }
 0x3ef   : > { %v977_v40 = vsub.f32 %v2279_v48, %v964_v63 }
 0x3f0   : > { %v1948_v0 = vpop.eup %1947 }
 0x3f1   : > { %v1950_v1 = vpop.eup %1949  ;;  %v991_v41 = vmul.f32 1.442695, %v977_v40  ;;  %v1017_v2 = vsel %vm654_vm2, %v1948_v0, 0.0  ;;  %v1063_v25 = vpop.permute.xlu0 %1062  ;;  %v999_v40 = vld [vmem:[#allocation6 + $0x20] sm:$0xff] }
 0x3f2   : > { %1018 = vadd.xlane.f32.xlu0 %v1017_v2  ;;  %v954_v3 = vpop.permute.xlu1 %953  ;;  %v1011_v43 = vsel %vm654_vm2, %v1950_v1, 0.0  ;;  %v1007_v35 = vmul.f32 %v2336_v46, %v999_v40  ;;  %v1055_v46 = vld [vmem:[#allocation3 + $0x18] sm:$0xff] }
 0x3f3   : > { %1955 = vpow2.f32 %v991_v41  ;;  %v975_v4 = vsub.f32 %v2281_v49, %v954_v3  ;;  %1012 = vadd.xlane.f32.xlu1 %v1011_v43  ;;  %v1000_v43 = vld [vmem:[#allocation6 + $0x28] sm:$0xff] }
 0x3f4   : > { %v1952_v5 = vpop.eup %1951 }
 0x3f5   : > { %v987_v45 = vmul.f32 1.442695, %v975_v4  ;;  %v1020_v6 = vsel %vm654_vm2, %v1952_v5, 0.0  ;;  %v1109_v7 = vpack.c.bf16 %v1952_v5, %v1948_v0  ;;  %v1078_v34 = vpop.permute.xlu0 %1077  ;;  %v1008_v5 = vmul.f32 %v2326_v39, %v1000_v43 }
 0x3f6   : > { %v959_v8 = vpop.permute.xlu1 %958 }
 0x3f7   : > { %1957 = vpow2.f32 %v987_v45  ;;  %v976_v48 = vsub.f32 %v2287_v52, %v959_v8  ;;  %1021 = vadd.xlane.f32.xlu1 %v1020_v6  ;;  %v1052_v8 = vld [vmem:[#allocation3] sm:$0xff] }
 0x3f8   : > { %v1954_v9 = vpop.eup %1953 }
 0x3f9   : > { %v989_v10 = vmul.f32 1.442695, %v976_v48  ;;  %v1014_v11 = vsel %vm654_vm2, %v1954_v9, 0.0  ;;  %v1108_v12 = vpack.c.bf16 %v1954_v9, %v1950_v1  ;;  %v1053_v9 = vld [vmem:[#allocation3 + $0x8] sm:$0xff] }
 0x3fa   : > { %1015 = vadd.xlane.f32.xlu0 %v1014_v11  ;;  %v969_v13 = vpop.permute.xlu1 %968 }
 0x3fb   : > { %1959 = vpow2.f32 %v989_v10  ;;  %v978_v49 = vsub.f32 %v2283_v50, %v969_v13  ;;  %1801 = vmatprep.mubr.msk.bf16.mxu1 %vm654_vm2, %v1108_v12  ;;  %v929_v50 = vmul.f32 1.442695, %v914_v31  ;;  %v2365_v36 = vpop.permute.xlu0 %1087  ;;  %v1100_v10 = vmul.f32 %v1063_v25, %v1052_v8 }
 0x3fc   : > { %1802 = vmatmul.mubr.msk.bf16.vlgmr.msra.gmra.mrb[4].mxu1 %vm654_vm2, %v1109_v7  ;;  %v1054_v7 = vld [vmem:[#allocation3 + $0x10] sm:$0xff]  ;;  %v1103_v12 = vmul.f32 %v1078_v34, %v1055_v46 }
 0x3fd   : > { %v1956_v15 = vpop.eup %1955  ;;  %v993_v16 = vmul.f32 1.442695, %v978_v49 }
 0x3fe   : > { %v1029_v17 = vsel %vm654_vm2, %v1956_v15, 0.0  ;;  %v1073_v18 = vpop.permute.xlu1 %1072 }
 0x3ff   : > { %1961 = vpow2.f32 %v993_v16  ;;  %1030 = vadd.xlane.f32.xlu0 %v1029_v17  ;;  %v1102_v48 = vmul.f32 %v1073_v18, %v1054_v7 }
 0x400   : > { %1963 = vpow2.f32 %v929_v50  ;;  %v1059_v50 = vld [vmem:[#allocation3 + $0x38] sm:$0xff] }
 0x401   : > { %v1958_v52 = vpop.eup %1957  ;;  %1965 = vpow2.f32 %v927_v29 }
 0x402   : > { %v1023_v19 = vsel %vm654_vm2, %v1958_v52, 0.0  ;;  %v1068_v31 = vpop.permute.xlu1 %1067 }
 0x403   : > { %1024 = vadd.xlane.f32.xlu0 %v1023_v19 }
 0x405   : > { %v1960_v21 = vpop.eup %1959 }
 0x406   : > { %v1110_v22 = vpack.c.bf16 %v1960_v21, %v1958_v52  ;;  %v1026_v28 = vsel %vm654_vm2, %v1960_v21, 0.0  ;;  %v2367_v38 = vpop.permute.xlu1 %1082  ;;  %v1058_v21 = vld [vmem:[#allocation3 + $0x30] sm:$0xff] }
 0x408   : > { %1805 = vmatprep.mubr.msk.bf16.mxu1 %vm654_vm2, %v1110_v22 }
 0x409   : > { %v1962_v23 = vpop.eup %1961 }
 0x40a   : > { %v1032_v26 = vsel %vm654_vm2, %v1962_v23, 0.0  ;;  %v1111_v27 = vpack.c.bf16 %v1962_v23, %v1956_v15  ;;  %v1964_v32 = vpop.eup %1963  ;;  %v1101_v15 = vmul.f32 %v1068_v31, %v1053_v9  ;;  %v1056_v23 = vld [vmem:[#allocation3 + $0x20] sm:$0xff] }
 0x40b   : > { %1033 = vadd.xlane.f32.xlu1 %v1032_v26  ;;  %v1966_v33 = vpop.eup %1965  ;;  %v1010_v2 = vmul.f32 %v1964_v32, %v1002_v44  ;;  %v1104_v29 = vmul.f32 %v2367_v38, %v1056_v23 }
 0x40c   : > { %1806 = vmatmul.mubr.msk.bf16.gmra.mrb[8].mxu1 %vm654_vm2, %v1111_v27  ;;  %v1009_v62 = vmul.f32 %v1966_v33, %v1001_v30  ;;  %v1057_v27 = vld [vmem:[#allocation3 + $0x28] sm:$0xff] }
 0x40d   : > { %v1105_v31 = vmul.f32 %v2365_v36, %v1057_v27 }
 0x40f   : > { %1027 = vadd.xlane.f32.xlu1 %v1026_v28 }
 0x419   : > { %1097 = vperm.xlu0 %1927, %v1964_v32  }
 0x420   : > { %1092 = vperm.xlu1 %1928, %v1966_v33  }
 0x47f   : > { %v1019_v53 = vpop.xlane.xlu0 %1018 }
 0x480   : > { %v1037_v20 = vadd.f32 %v1019_v53, %v1005_v51  ;;  %v1013_v24 = vpop.xlane.xlu1 %1012 }
 0x481   : > { %v1035_v55 = vadd.f32 %v1013_v24, %v1003_v14 }
 0x482   : > { %1046 = vst.msk [vmem:[#allocation6 + $0x10] sm:$0xff] %vm1043_vm4, %v1037_v20  ;;  %v2064_v20 = vmov (!%p1698_p12), 0  }
 0x483   : > { %1044 = vst.msk [vmem:[#allocation6] sm:$0xff] %vm1043_vm4, %v1035_v55  ;;  %1968 = vset.pattern.permute.xlu1 (!%p1698_p12), %v2064_v20  ;;  %1967 = vset.pattern.permute.xlu0 (!%p1698_p12), %v2064_v20  ;;  %v1969_v55 = vld [vmem:[%s2192_s18] sm:$0xff] (!%p1698_p12)  }
 0x484   : > { %v1022_v58 = vpop.xlane.xlu1 %1021  ;;  %1809 = vmatprep.subr.bf16.mxu0 (!%p1698_p12), %v1969_v55  ;;  %1833 = vmatprep.subr.bf16.mxu1 (!%p1698_p12), %v1969_v55 }
 0x485   : > { %v1038_v59 = vadd.f32 %v1022_v58, %v1006_v56  ;;  %1810 = vmatpush3.bf16.msra.mxu0 (!%p1698_p12), %v1969_v55  ;;  %1837 = vmatpush3.bf16.msra.mxu1 (!%p1698_p12), %v1969_v55 }
 0x487   : > { %1047 = vst.msk [vmem:[#allocation6 + $0x18] sm:$0xff] %vm1043_vm4, %v1038_v59  ;;  %v1016_v42 = vpop.xlane.xlu0 %1015 }
 0x488   : > { %v1036_v61 = vadd.f32 %v1016_v42, %v1004_v60  ;;  %v1970_v60 = vld [vmem:[%s2192_s18 + $0x8] sm:$0xff] (!%p1698_p12)  }
 0x489   : > { %v1227_v56 = vld [vmem:[#allocation6 + $0x10] sm:$0xff] (!%p1698_p12)  ;;  %1811 = vmatprep.subr.bf16.mxu0 (!%p1698_p12), %v1970_v60  ;;  %1834 = vmatprep.subr.bf16.mxu1 (!%p1698_p12), %v1970_v60 }
 0x48a   : > { %1045 = vst.msk [vmem:[#allocation6 + $0x8] sm:$0xff] %vm1043_vm4, %v1036_v61  ;;  %v1225_v14 = vld [vmem:[#allocation6] sm:$0xff] (!%p1698_p12)  ;;  %1812 = vmatpush3.bf16.msra.mxu0 (!%p1698_p12), %v1970_v60  ;;  %1838 = vmatpush3.bf16.msra.mxu1 (!%p1698_p12), %v1970_v60 }
 0x48c   : > { %v1031_v63 = vpop.xlane.xlu0 %1030 }
 0x48d   : > { %v1041_v0 = vadd.f32 %v1031_v63, %v1009_v62  ;;  %v1971_v62 = vld [vmem:[%s2192_s18 + $0x10] sm:$0xff] (!%p1698_p12)  }
 0x48e   : > { %v1228_v54 = vld [vmem:[#allocation6 + $0x18] sm:$0xff] (!%p1698_p12)  ;;  %1813 = vmatprep.subr.bf16.mxu0 (!%p1698_p12), %v1971_v62  ;;  %1835 = vmatprep.subr.bf16.mxu1 (!%p1698_p12), %v1971_v62 }
 0x48f   : > { %1050 = vst.msk [vmem:[#allocation6 + $0x30] sm:$0xff] %vm1043_vm4, %v1041_v0  ;;  %1814 = vmatpush3.bf16.msra.mxu0 (!%p1698_p12), %v1971_v62  ;;  %v1972_v0 = vld [vmem:[%s2192_s18 + $0x18] sm:$0xff] (!%p1698_p12)   ;;  %1839 = vmatpush3.bf16.msra.mxu1 (!%p1698_p12), %v1971_v62 }
 0x490   : > { %v1025_v1 = vpop.xlane.xlu0 %1024  ;;  %1815 = vmatprep.subr.bf16.mxu0 (!%p1698_p12), %v1972_v0  ;;  %1836 = vmatprep.subr.bf16.mxu1 (!%p1698_p12), %v1972_v0 }
 0x491   : > { %v1039_v41 = vadd.f32 %v1025_v1, %v1007_v35  ;;  %v1226_v24 = vld [vmem:[#allocation6 + $0x8] sm:$0xff] (!%p1698_p12) }
 0x493   : > { %1048 = vst.msk [vmem:[#allocation6 + $0x20] sm:$0xff] %vm1043_vm4, %v1039_v41  ;;  %1816 = vmatpush3.bf16.msra.mxu0 (!%p1698_p12), %v1972_v0  ;;  %1840 = vmatpush3.bf16.msra.mxu1 (!%p1698_p12), %v1972_v0 }
 0x496   : > { %v1231_v58 = vld [vmem:[#allocation6 + $0x30] sm:$0xff] (!%p1698_p12) }
 0x498   : > { %v1034_v3 = vpop.xlane.xlu1 %1033  ;;  %v1098_v26 = vpop.permute.xlu0 %1097 }
 0x499   : > { %v1042_v4 = vadd.f32 %v1034_v3, %v1010_v2  ;;  %v1107_v33 = vmul.f32 %v1098_v26, %v1059_v50 }
 0x49a   : > { %v1229_v38 = vld [vmem:[#allocation6 + $0x20] sm:$0xff] (!%p1698_p12) }
 0x49b   : > { %1051 = vst.msk [vmem:[#allocation6 + $0x38] sm:$0xff] %vm1043_vm4, %v1042_v4  ;;  %1973 = vrcp.f32 (!%p1698_p12), %v1229_v38 }
 0x49c   : > { %v1028_v45 = vpop.xlane.xlu1 %1027  ;;  %1975 = vrcp.f32 (!%p1698_p12), %v1225_v14 }
 0x49d   : > { %v1040_v6 = vadd.f32 %v1028_v45, %v1008_v5 }
 0x49f   : > { %1049 = vst.msk [vmem:[#allocation6 + $0x28] sm:$0xff] %vm1043_vm4, %v1040_v6 }
 0x4a0   : > { %v1093_v22 = vpop.permute.xlu1 %1092 }
 0x4a1   : > { %v1106_v28 = vmul.f32 %v1093_v22, %v1058_v21 }
 0x4a2   : > { %v1232_v57 = vld [vmem:[#allocation6 + $0x38] sm:$0xff] (!%p1698_p12) }
 0x4a5   : > { %v1974_v59 = vpop.eup (!%p1698_p12), %1973 }
 0x4a6   : > { %v1230_v36 = vld [vmem:[#allocation6 + $0x28] sm:$0xff] (!%p1698_p12)  ;;  %v1976_v42 = vpop.eup (!%p1698_p12), %1975  ;;  %1263 = vperm.xlu1 (!%p1698_p12), %1968, %v1974_v59  }
 0x4a7   : > { %1977 = vrcp.f32 (!%p1698_p12), %v1230_v36  ;;  %1243 = vperm.xlu0 (!%p1698_p12), %1967, %v1976_v42  }
 0x4a8   : > { %1979 = vrcp.f32 (!%p1698_p12), %v1226_v24 }
 0x4a9   : > { %1981 = vrcp.f32 (!%p1698_p12), %v1228_v54 }
 0x4aa   : > { %1983 = vrcp.f32 (!%p1698_p12), %v1227_v56 }
 0x4ab   : > { %1985 = vrcp.f32 (!%p1698_p12), %v1232_v57 }
 0x4ac   : > { %1987 = vrcp.f32 (!%p1698_p12), %v1231_v58 }
 0x4b1   : > { %v1978_v61 = vpop.eup (!%p1698_p12), %1977 }
 0x4b2   : > { %v1980_v30 = vpop.eup (!%p1698_p12), %1979  ;;  %1268 = vperm.xlu1 (!%p1698_p12), %1968, %v1978_v61  }
 0x4b3   : > { %v1982_v63 = vpop.eup (!%p1698_p12), %1981  ;;  %1248 = vperm.xlu0 (!%p1698_p12), %1967, %v1980_v30  }
 0x4b4   : > { %v1984_v40 = vpop.eup (!%p1698_p12), %1983 }
 0x4b5   : > { %v1986_v35 = vpop.eup (!%p1698_p12), %1985 }
 0x4b6   : > { %1258 = vperm.xlu1 (!%p1698_p12), %1968, %v1982_v63   ;;  %v1988_v1 = vpop.eup (!%p1698_p12), %1987 }
 0x4b7   : > { %1253 = vperm.xlu0 (!%p1698_p12), %1967, %v1984_v40  }
 0x4ba   : > { %1278 = vperm.xlu1 (!%p1698_p12), %1968, %v1986_v35  }
 0x4bb   : > { %1273 = vperm.xlu0 (!%p1698_p12), %1967, %v1988_v1  }
 0x4cf   : > { %v1803_v11 = vpop.f32.mrb[4].mxu1 }
 0x4d0   : > { %v1191_v13 = vadd.f32 %v1803_v11, %v1102_v48  ;;  %v1158_v49 = vpop.f32.mrb[5].mxu1 }
 0x4d1   : > { %v1189_v16 = vadd.f32 %v1158_v49, %v1100_v10  ;;  %v1804_v17 = vpop.f32.mrb[6].mxu1 }
 0x4d2   : > { %1199 = vst.msk [vmem:[#allocation3 + $0x10] sm:$0xff] %vm783_vm3, %v1191_v13  ;;  %v1192_v39 = vadd.f32 %v1804_v17, %v1103_v12  ;;  %v1161_v52 = vpop.f32.mrb[7].mxu1 }
 0x4d3   : > { %1197 = vst.msk [vmem:[#allocation3] sm:$0xff] %vm783_vm3, %v1189_v16  ;;  %v1190_v19 = vadd.f32 %v1161_v52, %v1101_v15 }
 0x4d4   : > { %1200 = vst.msk [vmem:[#allocation3 + $0x18] sm:$0xff] %vm783_vm3, %v1192_v39 }
 0x4d5   : > { %1198 = vst.msk [vmem:[#allocation3 + $0x8] sm:$0xff] %vm783_vm3, %v1190_v19 }
 0x4d9   : > { %v1219_v9 = vld [vmem:[#allocation3 + $0x10] sm:$0xff] (!%p1698_p12) }
 0x4da   : > { %v1217_v43 = vld [vmem:[#allocation3] sm:$0xff] (!%p1698_p12) }
 0x4db   : > { %v1220_v48 = vld [vmem:[#allocation3 + $0x18] sm:$0xff] (!%p1698_p12) }
 0x4dc   : > { %v1218_v4 = vld [vmem:[#allocation3 + $0x8] sm:$0xff] (!%p1698_p12) }
 0x4df   : > { %v1807_v32 = vpop.f32.mrb[8].mxu1  ;;  %1216 = sbr.rel (%p1698_p12) target bundleno = 1580 (0x62c), region = 56 }
 0x4e0   : > { %v1195_v18 = vadd.f32 %v1807_v32, %v1106_v28  ;;  %v1174_v25 = vpop.f32.mrb[9].mxu1 }
 0x4e1   : > { %v1193_v34 = vadd.f32 %v1174_v25, %v1104_v29  ;;  %v1808_v37 = vpop.f32.mrb[10].mxu1 }
 0x4e2   : > { %1203 = vst.msk [vmem:[#allocation3 + $0x30] sm:$0xff] %vm783_vm3, %v1195_v18  ;;  %v1196_v47 = vadd.f32 %v1808_v37, %v1107_v33  ;;  %v1177_v51 = vpop.f32.mrb[11].mxu1 }
 0x4e3   : > { %1201 = vst.msk [vmem:[#allocation3 + $0x20] sm:$0xff] %vm783_vm3, %v1193_v34  ;;  %v1194_v53 = vadd.f32 %v1177_v51, %v1105_v31 }
 0x4e4   : > { %1204 = vst.msk [vmem:[#allocation3 + $0x38] sm:$0xff] %vm783_vm3, %v1196_v47 }
 0x4e5   : > { %1202 = vst.msk [vmem:[#allocation3 + $0x28] sm:$0xff] %vm783_vm3, %v1194_v53 }
 0x4e9   : > { %v1223_v17 = vld [vmem:[#allocation3 + $0x30] sm:$0xff] }
 0x4ea   : > { %v1221_v2 = vld [vmem:[#allocation3 + $0x20] sm:$0xff] }
 0x4eb   : > { %v1224_v16 = vld [vmem:[#allocation3 + $0x38] sm:$0xff] }
 0x4ec   : > { %v1222_v3 = vld [vmem:[#allocation3 + $0x28] sm:$0xff] }
 0x525   : > { %v1264_v41 = vpop.permute.xlu1 %1263 }
 0x526   : > { %v1244_v44 = vpop.permute.xlu0 %1243  ;;  %v1285_v45 = vmul.f32 %v1264_v41, %v1221_v2 }
 0x527   : > { %v1281_v8 = vmul.f32 %v1244_v44, %v1217_v43 }
 0x531   : > { %v1269_v5 = vpop.permute.xlu1 %1268 }
 0x532   : > { %v1286_v6 = vmul.f32 %v1269_v5, %v1222_v3  ;;  %v1249_v7 = vpop.permute.xlu0 %1248 }
 0x533   : > { %v1282_v46 = vmul.f32 %v1249_v7, %v1218_v4 }
 0x534   : > { %v1291_v10 = vpack.c.bf16 %v1286_v6, %v1285_v45 }
 0x535   : > { %v1259_v11 = vpop.permute.xlu1 %1258  ;;  %v1289_v12 = vpack.c.bf16 %v1282_v46, %v1281_v8 }
 0x536   : > { %v1284_v13 = vmul.f32 %v1259_v11, %v1220_v48  ;;  %v1254_v49 = vpop.permute.xlu0 %1253  ;;  %1821 = vmatprep.mubr.msk.bf16.mxu1 %vm783_vm3, %v1291_v10 }
 0x537   : > { %v1283_v15 = vmul.f32 %v1254_v49, %v1219_v9  ;;  %1817 = vmatprep.mubr.msk.bf16.mxu0 %vm783_vm3, %v1289_v12 }
 0x539   : > { %v1290_v39 = vpack.c.bf16 %v1284_v13, %v1283_v15  ;;  %v1279_v52 = vpop.permute.xlu1 %1278 }
 0x53a   : > { %v1288_v19 = vmul.f32 %v1279_v52, %v1224_v16  ;;  %v1274_v21 = vpop.permute.xlu0 %1273 }
 0x53b   : > { %v1287_v22 = vmul.f32 %v1274_v21, %v1223_v17  ;;  %1818 = vmatmul.mubr.msk.bf16.vlgmr.msra.gmra.mrb[0].mxu0 %vm783_vm3, %v1290_v39 }
 0x53d   : > { %v1292_v23 = vpack.c.bf16 %v1288_v19, %v1287_v22 }
 0x53f   : > { %1822 = vmatmul.mubr.msk.bf16.vlgmr.msra.gmra.mrb[0].mxu1 %vm783_vm3, %v1292_v23 }
 0x60e   : > { %v1819_v50 = vpop.f32.mrb[0].mxu0 }
 0x60f   : > { %v1371_v26 = vpop.f32.mrb[1].mxu0  ;;  %1405 = sbr.rel (%p1707_p13) target bundleno = 1559 (0x617), region = 60  ;;  %1408 = vst.msk [vmem:[#allocation4 + $0x10] sm:$0xff] (!%p1707_p13), %vm783_vm3, %v1819_v50 }
 0x610   : > { %v1820_v27 = vpop.f32.mrb[2].mxu0  ;;  %1406 = vst.msk [vmem:[#allocation4] sm:$0xff] (!%p1707_p13), %vm783_vm3, %v1371_v26 }
 0x611   : > { %v1374_v28 = vpop.f32.mrb[3].mxu0  ;;  %1409 = vst.msk [vmem:[#allocation4 + $0x18] sm:$0xff] (!%p1707_p13), %vm783_vm3, %v1820_v27 }
 0x612   : > { %v1823_v29 = vpop.f32.mrb[0].mxu1  ;;  %1407 = vst.msk [vmem:[#allocation4 + $0x8] sm:$0xff] (!%p1707_p13), %vm783_vm3, %v1374_v28 }
 0x613   : > { %v1387_v32 = vpop.f32.mrb[1].mxu1  ;;  %1412 = vst.msk [vmem:[#allocation4 + $0x30] sm:$0xff] (!%p1707_p13), %vm783_vm3, %v1823_v29 }
 0x614   : > { %v1824_v33 = vpop.f32.mrb[2].mxu1  ;;  %1410 = vst.msk [vmem:[#allocation4 + $0x20] sm:$0xff] (!%p1707_p13), %vm783_vm3, %v1387_v32 }
 0x615   : > { %v1390_v18 = vpop.f32.mrb[3].mxu1  ;;  %1413 = vst.msk [vmem:[#allocation4 + $0x38] sm:$0xff] (!%p1707_p13), %vm783_vm3, %v1824_v33 }
 0x616   : > { %1411 = vst.msk [vmem:[#allocation4 + $0x28] sm:$0xff] %vm783_vm3, %v1390_v18 }
 0x617 PF: > { %p1708_p0 = scmp.le.s32.totalorder %s2031_s25, 0 }
 0x618   : > { %v1418_v25 = vld [vmem:[#allocation4] sm:$0xff] (!%p1708_p0)  ;;  %v1420_v34 = vld [vmem:[#allocation4 + $0x10] sm:$0xff] (!%p1708_p0) }
 0x619   : > { %1417 = sbr.rel (%p1708_p0) target bundleno = 1569 (0x621), region = 64  ;;  %v1426_v37 = vadd.f32 (!%p1708_p0), %v1418_v25, %v1371_v26  ;;  %v1428_v51 = vadd.f32 (!%p1708_p0), %v1819_v50, %v1420_v34  ;;  %v1421_v53 = vld [vmem:[#allocation4 + $0x18] sm:$0xff] (!%p1708_p0) }
 0x61a   : > { %v1419_v31 = vld [vmem:[#allocation4 + $0x8] sm:$0xff] (!%p1708_p0)  ;;  %v1429_v36 = vadd.f32 (!%p1708_p0), %v1820_v27, %v1421_v53 }
 0x61b   : > { %v1427_v47 = vadd.f32 (!%p1708_p0), %v1419_v31, %v1374_v28  ;;  %v1424_v54 = vld [vmem:[#allocation4 + $0x30] sm:$0xff] (!%p1708_p0)  ;;  %1434 = vst.msk [vmem:[#allocation4] sm:$0xff] (!%p1708_p0), %vm783_vm3, %v1426_v37  ;;  %1436 = vst.msk [vmem:[#allocation4 + $0x10] sm:$0xff] (!%p1708_p0), %vm783_vm3, %v1428_v51 }
 0x61c   : > { %v1422_v38 = vld [vmem:[#allocation4 + $0x20] sm:$0xff] (!%p1708_p0)  ;;  %v1432_v56 = vadd.f32 (!%p1708_p0), %v1823_v29, %v1424_v54  ;;  %1437 = vst.msk [vmem:[#allocation4 + $0x18] sm:$0xff] (!%p1708_p0), %vm783_vm3, %v1429_v36 }
 0x61d   : > { %v1423_v14 = vld [vmem:[#allocation4 + $0x28] sm:$0xff] (!%p1708_p0)  ;;  %v1430_v20 = vadd.f32 (!%p1708_p0), %v1422_v38, %v1387_v32  ;;  %v1425_v55 = vld [vmem:[#allocation4 + $0x38] sm:$0xff] (!%p1708_p0)  ;;  %1435 = vst.msk [vmem:[#allocation4 + $0x8] sm:$0xff] (!%p1708_p0), %vm783_vm3, %v1427_v47 }
 0x61e   : > { %v1431_v24 = vadd.f32 (!%p1708_p0), %v1423_v14, %v1390_v18  ;;  %v1433_v57 = vadd.f32 (!%p1708_p0), %v1824_v33, %v1425_v55  ;;  %1440 = vst.msk [vmem:[#allocation4 + $0x30] sm:$0xff] (!%p1708_p0), %vm783_vm3, %v1432_v56 }
 0x61f   : > { %1438 = vst.msk [vmem:[#allocation4 + $0x20] sm:$0xff] (!%p1708_p0), %vm783_vm3, %v1430_v20 }
 0x620   : > { %1439 = vst.msk [vmem:[#allocation4 + $0x28] sm:$0xff] %vm783_vm3, %v1431_v24  ;;  %1441 = vst.msk [vmem:[#allocation4 + $0x38] sm:$0xff] %vm783_vm3, %v1433_v57 }
 0x621 PF: > { %p1709_p1 = scmp.ne.s32.totalorder %s2031_s25, 1 }
 0x622   : > { %v1710_v59 = vld [vmem:[%s2473_s6] ss:$0 sm:$0xff] (!%p1709_p1) }
 0x623   : > { %1445 = sbr.rel (%p1709_p1) target bundleno = 1580 (0x62c), region = 68  ;;  %v1446_v58 = vld [vmem:[#allocation4] sm:$0xff] (!%p1709_p1)  ;;  %v1448_v30 = vld [vmem:[#allocation4 + $0x10] sm:$0xff] (!%p1709_p1) }
 0x624   : > { %v1461_v42 = vadd.f32 (!%p1709_p1), %v1710_v59, %v1446_v58  ;;  %v1449_v62 = vld [vmem:[#allocation4 + $0x18] sm:$0xff] (!%p1709_p1)  ;;  %v1463_v40 = vadd.f32 (!%p1709_p1), %v1710_v59, %v1448_v30 }
 0x625   : > { %v1447_v60 = vld [vmem:[#allocation4 + $0x8] sm:$0xff] (!%p1709_p1)  ;;  %v1464_v0 = vadd.f32 (!%p1709_p1), %v1710_v59, %v1449_v62 }
 0x626   : > { %v1462_v61 = vadd.f32 (!%p1709_p1), %v1710_v59, %v1447_v60  ;;  %v1452_v41 = vld [vmem:[#allocation4 + $0x30] sm:$0xff] (!%p1709_p1)  ;;  %1469 = vst.msk [vmem:[%s2177_s10] sm:$0xff] (!%p1709_p1), %vm783_vm3, %v1461_v42  ;;  %1471 = vst.msk [vmem:[%s2177_s10 + $0x10] sm:$0xff] (!%p1709_p1), %vm783_vm3, %v1463_v40 }
 0x627   : > { %v1450_v63 = vld [vmem:[#allocation4 + $0x20] sm:$0xff] (!%p1709_p1)  ;;  %v1451_v1 = vld [vmem:[#allocation4 + $0x28] sm:$0xff] (!%p1709_p1)  ;;  %v1453_v44 = vld [vmem:[#allocation4 + $0x38] sm:$0xff] (!%p1709_p1)  ;;  %v1467_v3 = vadd.f32 (!%p1709_p1), %v1710_v59, %v1452_v41  ;;  %1472 = vst.msk [vmem:[%s2177_s10 + $0x18] sm:$0xff] (!%p1709_p1), %vm783_vm3, %v1464_v0 }
 0x628   : > { %v1465_v35 = vadd.f32 (!%p1709_p1), %v1710_v59, %v1450_v63  ;;  %1470 = vst.msk [vmem:[%s2177_s10 + $0x8] sm:$0xff] (!%p1709_p1), %vm783_vm3, %v1462_v61  ;;  %v1466_v2 = vadd.f32 (!%p1709_p1), %v1710_v59, %v1451_v1  ;;  %v1468_v43 = vadd.f32 (!%p1709_p1), %v1710_v59, %v1453_v44 }
 0x629   : > { %1475 = vst.msk [vmem:[%s2177_s10 + $0x30] sm:$0xff] (!%p1709_p1), %vm783_vm3, %v1467_v3 }
 0x62a   : > { %1473 = vst.msk [vmem:[%s2177_s10 + $0x20] sm:$0xff] %vm783_vm3, %v1465_v35  ;;  %1474 = vst.msk [vmem:[%s2177_s10 + $0x28] sm:$0xff] %vm783_vm3, %v1466_v2 }
 0x62b   : > { %1476 = vst.msk [vmem:[%s2177_s10 + $0x38] sm:$0xff] %vm783_vm3, %v1468_v43 }
 0x62c PF: > { %s17_s9 = sadd.s32 1, %s2059_s9   ;;  %s2485_s25 = sld [smem:[#allocation7_spill]] }
 0x62d   : > { %p14_p2 = scmp.ge.s32.totalorder %s17_s9, 18   ;;  %s2486_s26 = sld [smem:[#allocation8_spill]] }
 0x62e   : > { %s2487_s27 = sld [smem:[#allocation9_spill]]  ;;  %s2488_s30 = sld [smem:[#allocation10_spill]] }
 0x62f   : > { %s2489_s29 = sld [smem:[#allocation11_spill]]  ;;  %s2490_s13 = sld [smem:[#allocation12_spill]] }
 0x630   : > { %s2491_s8 = sld [smem:[#allocation13_spill]]  ;;  %s2492_s24 = smov %s2043_s28 }
 0x631   :  { %16 = sbr.rel (!%p14_p2) target bundleno = 5 (0x5), region = 113 }
 0x634   : > { %s2493_s28 = smov %s2488_s30 }
 0x635   : > { %s2494_s30 = smov %s2490_s13 }

</bundles_post_ra>
